<compile_context>
chip_gen: v5e
topology: v5e:2x2
jax: 0.10.0
libtpu: 0.0.40
codegen_flags: <defaults>
</compile_context>

<pallas_src>
import jax
import jax.numpy as jnp
from jax.experimental import pallas as pl
from jax.experimental.pallas import tpu as pltpu


def _scale_shift_kernel(x_ref, o_ref):
    # Single fused VPU pass over the block: y = x * 2 + 3 (dtype-preserving).
    o_ref[...] = x_ref[...] * 2 + 3


# Lane-dense last-dim candidates (widest first); all multiples of 128.
_LANE_CANDIDATES = (2048, 1024, 512, 256, 128)
# Per-block byte budget (~4 MiB). With input + output double buffering the
# in-flight VMEM is ~16 MiB, safe on v5e/v6e (128 MiB) and v7x (64 MiB).
_BLOCK_BYTE_BUDGET = 4 * 1024 * 1024


def scale_shift(x):
    orig_shape = x.shape
    total = x.size
    itemsize = x.dtype.itemsize

    # Pick the widest lane width that divides the element count exactly so the
    # 2D slab needs no padding at all (reshape is layout-free for a dense
    # contiguous array).
    lane = None
    for cand in _LANE_CANDIDATES:
        if total % cand == 0:
            lane = cand
            break

    padded = False
    if lane is None:
        # Truly odd size: fall back to one pad pass to a 128-lane multiple.
        lane = 128
        padded_total = pl.cdiv(total, lane) * lane
        flat = jnp.pad(x.reshape(-1), (0, padded_total - total))
        x2d = flat.reshape(padded_total // lane, lane)
        padded = True
    else:
        x2d = x.reshape(total // lane, lane)

    rows = x2d.shape[0]

    # Block sizing:
    #  * byte budget (dtype-aware), rounded down to an 8-sublane multiple;
    #  * when rows > 8, also cap at ~rows/2 (8-aligned) so grid >= 2 steps and
    #    both v7x TensorCores stream the "parallel" axis.
    # The ragged last block (rows % block_rows != 0) is handled by Pallas;
    # safe here because the op is purely elementwise.
    if rows <= 8:
        block_rows = rows
    else:
        budget_rows = max(8, (_BLOCK_BYTE_BUDGET // (lane * itemsize)) // 8 * 8)
        parallel_rows = max(8, (rows // 2) // 8 * 8)
        block_rows = min(budget_rows, parallel_rows)

    grid_rows = pl.cdiv(rows, block_rows)

    out2d = pl.pallas_call(
        _scale_shift_kernel,
        out_shape=jax.ShapeDtypeStruct((rows, lane), x.dtype),
        grid=(grid_rows,),
        in_specs=[pl.BlockSpec((block_rows, lane), lambda i: (i, 0))],
        out_specs=pl.BlockSpec((block_rows, lane), lambda i: (i, 0)),
        compiler_params=pltpu.CompilerParams(
            dimension_semantics=("parallel",),
            vmem_limit_bytes=32 * 1024 * 1024,
        ),
    )(x2d)

    if padded:
        # Undo the lane padding only on the rare non-128-divisible path.
        return out2d.reshape(-1)[:total].reshape(orig_shape)
    return out2d.reshape(orig_shape)


if __name__ == "__main__":
    key = jax.random.PRNGKey(0)
    x = jax.random.normal(key, (2, 4, 16, 16), dtype=jnp.float32)

    out = scale_shift(x)
    out = jax.block_until_ready(out)

    # Reference check (pure JAX)
    ref = x * 2 + 3
    assert out.shape == x.shape
    assert out.dtype == x.dtype
    assert jnp.allclose(out, ref, atol=1e-6, rtol=1e-6)

    print("KERNEL_OK")
</pallas_src>

<mosaic_0001>
module attributes {stable_mosaic.version = 11 : i64} {
  func.func @_scale_shift_kernel(%arg0: i32, %arg1: memref<1x2048xf32, #tpu.memory_space<vmem>>, %arg2: memref<1x2048xf32, #tpu.memory_space<vmem>>) attributes {dimension_semantics = [#tpu.dimension_semantics<parallel>], iteration_bounds = array<i64: 1>, scalar_prefetch = 0 : i64, scratch_operands = 0 : i64, tpu.core_type = #tpu.core_type<tc>, window_params = [{transform_indices = @transform_0, window_bounds = array<i64: 1, 2048>}, {transform_indices = @transform_1, window_bounds = array<i64: 1, 2048>}]} {
    %c0 = arith.constant 0 : index
    %c0_0 = arith.constant 0 : index
    %0 = vector.load %arg1[%c0, %c0_0] : memref<1x2048xf32, #tpu.memory_space<vmem>>, vector<1x2048xf32>
    %cst = arith.constant 2.000000e+00 : f32
    %1 = vector.broadcast %cst : f32 to vector<1x2048xf32>
    %2 = arith.mulf %0, %1 : vector<1x2048xf32>
    %cst_1 = arith.constant 3.000000e+00 : f32
    %3 = vector.broadcast %cst_1 : f32 to vector<1x2048xf32>
    %4 = arith.addf %2, %3 : vector<1x2048xf32>
    %c0_2 = arith.constant 0 : index
    %c0_3 = arith.constant 0 : index
    %5 = vector.load %arg2[%c0_2, %c0_3] : memref<1x2048xf32, #tpu.memory_space<vmem>>, vector<1x2048xf32>
    tpu.vector_store %arg2[%c0_2, %c0_3], %4 {strides = array<i32>} : memref<1x2048xf32, #tpu.memory_space<vmem>>, vector<1x2048xf32>,
    return
  }
  func.func @transform_0(%arg0: i32) -> (i32, i32) {
    %c0_i32 = arith.constant 0 : i32
    %c0_i32_0 = arith.constant 0 : i32
    return %arg0, %c0_i32 : i32, i32
  }
  func.func @transform_1(%arg0: i32) -> (i32, i32) {
    %c0_i32 = arith.constant 0 : i32
    %c0_i32_0 = arith.constant 0 : i32
    return %arg0, %c0_i32 : i32, i32
  }
}

</mosaic_0001>

<bundles_post_ra>
// kernel: tpu_custom_call.1
= control target key start
LH: loop header
LB: loop body
LE: loop exit
PB: predicated region body
PF: predicated region fallthrough
CT: control target
= control target key end

     0   :  { %6 = vsyncpa [#allocation3], 0  ;;  %s120_s0 = inlined_call_operand.hbm [shape: f32[1,2048], index: 0, kind: input, shape index: {}]   ;;  %s121_s1 = inlined_call_operand.hbm [shape: f32[1,2048], index: 1, kind: output, shape index: {}]  }
   0x1   :  { %7 = vsyncpa [#allocation4], 0  ;;  %s13_s8 = sshll.u32 %s120_s0, 4  ;;  %s102_s9 = smov [#allocation2]   ;;  %s14_s8 = int_to_ptr.hbm [resolvable:$true] %s13_s8 }
   0x2   :  { %s15_s10 = sshll.u32 %s102_s9, 4  ;;  %s16_s10 = int_to_ptr.vmem [resolvable:$true] %s15_s10 }
   0x3   :  { %18 = dma.hbm_to_vmem [thread:$0]  %s14_s8, 256, %s16_s10, [#allocation3]  }
   0x4   :  { %98 = dma.done.wait [#allocation3], 256  }
   0x5   :  { %99 = vsyncadd [#allocation3], 4294967040  ;;  %v23_v0 = vld [vmem:[#allocation2] sm:$0xff]  ;;  %v24_v1 = vld [vmem:[#allocation2 + $0x8] sm:$0xff]  ;;  %s103_s11 = smov [#allocation5]   ;;  %s38_s15 = sshll.u32 %s121_s1, 4  ;;  %s39_s15 = int_to_ptr.hbm [resolvable:$true] %s38_s15 }
   0x6   :  { %v25_v2 = vmul.f32 2.0, %v23_v0  ;;  %v26_v3 = vmul.f32 2.0, %v24_v1  ;;  %s36_s12 = sshll.u32 %s103_s11, 4  ;;  %s37_s12 = int_to_ptr.vmem [resolvable:$true] %s36_s12 }
   0x8   :  { %v27_v4 = vadd.f32 3.0, %v25_v2  ;;  %v28_v5 = vadd.f32 3.0, %v26_v3 }
   0xa   :  { %29 = vst [vmem:[#allocation5] sm:$0xff] %v27_v4 }
   0xb   :  { %30 = vst [vmem:[#allocation5 + $0x8] sm:$0xff] %v28_v5 }
   0xc   :  { %41 = dma.vmem_to_hbm [thread:$0]  %s37_s12, 256, %s39_s15, [#allocation4]  }
   0xd   :  { %100 = dma.done.wait [#allocation4], 256  }
   0xe   :  { %101 = vsyncadd [#allocation4], 4294967040 }
   0xf   :  { %46 = vsyncpa [#allocation3], 1 }
  0x10   :  { %47 = vsyncpa [#allocation4], 1 }

</bundles_post_ra>
